<compile_context>
chip_gen: v7x
topology: tpu7x:2x2x1
jax: 0.10.0
libtpu: 0.0.40
codegen_flags: <defaults>
</compile_context>

<pallas_src>
import functools

import jax
import jax.numpy as jnp
from jax.experimental import pallas as pl
from jax.experimental.pallas import tpu as pltpu


def _pair(v):
    return tuple(v) if isinstance(v, (tuple, list)) else (int(v), int(v))


def _round_up(x, m):
    return -(-x // m) * m


def _vmem_limit_bytes():
    """Generation-aware VMEM budget: ~75% of physical, capped at 100 MiB."""
    cap = 64 * 1024 * 1024
    try:
        info = pltpu.get_tpu_info()
        cap = int(getattr(info, "vmem_capacity_bytes", cap))
    except Exception:
        pass
    return int(min(cap * 3 // 4, 100 * 1024 * 1024))


def _choose_row_tile(n, ho, wo, cout_p, max_tile_bytes, min_blocks=4):
    """Output row-tile: sublane-aligned, >= min_blocks grid blocks (v7x 2 TCs),
    minimal ragged-row padding, then as big as possible."""
    cands = []
    for rt in range(1, ho + 1):
        aligned = (rt >= ho) or ((rt * wo) % 8 == 0)
        fits = rt * wo * cout_p * 2 <= max_tile_bytes          # bf16 output tile
        if aligned and fits:
            cands.append(rt)
    if not cands:
        cands = [rt for rt in range(1, ho + 1) if (rt >= ho) or ((rt * wo) % 8 == 0)]
    if not cands:
        cands = [ho]

    def waste(rt):
        return _round_up(ho, rt) - ho

    pref = [rt for rt in cands if n * (-(-ho // rt)) >= min_blocks]
    pool = pref if pref else cands
    return min(pool, key=lambda rt: (waste(rt), -rt))


def _choose_sub_rows(row_tile, wo, cout_p):
    """Rows per inner sub-block: keep the live f32 accumulator <= ~32 vregs (128 KiB)."""
    max_rows = max(8, (128 * 1024) // (cout_p * 4))
    best = 1
    for s in range(1, row_tile + 1):
        if row_tile % s == 0 and s * wo <= max_rows:
            best = s
    return best


def _conv_bn_relu_kernel(x_ref, w_ref, b_ref, o_ref, *,
                         kh, sh, dh, row_tile, sub_rows, wo):
    """Fused conv + BN(eval) + ReLU for one (batch, row-tile) output block.

    x_ref: (Hin_p, Wo, kw*Cin)    W-tap/stride-packed, zero-padded image (bf16)
    w_ref: (kh, kw*Cin, Cout_p)   BN-scale-folded conv weight (bf16)
    b_ref: (1, Cout_p)            folded BN bias (f32)
    o_ref: (row_tile*Wo, Cout_p)  output tile (bf16)
    """
    kwc = x_ref.shape[-1]
    m_sub = sub_rows * wo
    num_sub = row_tile // sub_rows
    r = pl.program_id(1)

    def sub_block(s, carry):
        out_row0 = r * row_tile + s * sub_rows       # first output row of this sub-block

        def tap(ki):
            start = out_row0 * sh + ki * dh
            if sh == 1:
                rows = x_ref[pl.ds(start, sub_rows), :, :]
            else:
                # Strided slice only on the H (major) axis; the W stride was already
                # deinterleaved in the wrapper so sublane/lane axes stay unit-stride.
                rows = x_ref[pl.ds(start, sub_rows, sh), :, :]
            return rows.reshape(m_sub, kwc)

        # kh chained MXU dots with K = kw*Cin, back-to-back (v7x MRB-friendly); the
        # accumulator stays within ~32 vregs -> no VMEM read-modify-write per tap.
        acc = jnp.dot(tap(0), w_ref[0], preferred_element_type=jnp.float32)
        for ki in range(1, kh):
            acc = acc + jnp.dot(tap(ki), w_ref[ki], preferred_element_type=jnp.float32)

        y = jnp.maximum(acc + b_ref[...], 0.0)
        m0 = s * m_sub
        if m_sub % 8 == 0 and not isinstance(m0, int):
            m0 = pl.multiple_of(m0, 8)
        o_ref[pl.ds(m0, m_sub), :] = y.astype(o_ref.dtype)
        return carry

    if num_sub == 1:
        sub_block(0, 0)
    else:
        jax.lax.fori_loop(0, num_sub, sub_block, 0, unroll=num_sub <= 8)


@functools.partial(jax.jit,
                   static_argnames=("kernel_size", "stride", "padding", "dilation"))
def basic_conv2d(x_nchw, weight_oihw, gamma, beta, running_mean, running_var,
                 *, kernel_size, stride=1, padding=0, dilation=1, eps=1e-5):
    """Forward of BasicConv2d (inference-mode BN). NCHW in / NCHW out (bf16)."""
    n, cin, h, w = x_nchw.shape
    cout = weight_oihw.shape[0]
    kh, kw = _pair(kernel_size)
    sh, sw = _pair(stride)
    ph, pw = _pair(padding)
    dh, dw = _pair(dilation)

    ho = (h + 2 * ph - dh * (kh - 1) - 1) // sh + 1
    wo = (w + 2 * pw - dw * (kw - 1) - 1) // sw + 1

    # Lane-dense output stores: pad Cout to a multiple of 128 (no-op for production
    # channel counts that already are multiples of 128).
    cout_p = _round_up(cout, 128)

    vmem_budget = _vmem_limit_bytes()
    row_tile = _choose_row_tile(n, ho, wo, cout_p,
                                max_tile_bytes=min(8 << 20, vmem_budget // 8))
    grid_rows = -(-ho // row_tile)
    ho_pad = grid_rows * row_tile                    # ragged rows handled via zero-pad
    sub_rows = _choose_sub_rows(row_tile, wo, cout_p)

    # --- Input prep (one fused XLA pass): NCHW->NHWC, conv zero-pad (+ ragged-row pad),
    # deinterleave the kw taps and the W stride so kw*Cin sits dense on the lane axis,
    # cast to bf16 for the MXU.  Only a ~kw/sw-fold pack, not a full im2col.
    hin_need = (ho_pad - 1) * sh + (kh - 1) * dh + 1
    extra_h = max(0, hin_need - (h + 2 * ph))
    x_nhwc = jnp.transpose(x_nchw, (0, 2, 3, 1))
    x_pad = jnp.pad(x_nhwc, ((0, 0), (ph, ph + extra_h), (pw, pw), (0, 0)))
    taps = [x_pad[:, :, kj * dw: kj * dw + (wo - 1) * sw + 1: sw, :] for kj in range(kw)]
    x_packed = jnp.concatenate(taps, axis=-1).astype(jnp.bfloat16)   # (N, Hin_p, Wo, kw*Cin)
    hin_p = x_packed.shape[1]

    # --- Fold inference-mode BN into the conv weight; bias stays f32.
    scale = gamma * jax.lax.rsqrt(running_var + eps)                 # (Cout,)
    bias = (beta - running_mean * scale).astype(jnp.float32)
    w_hwio = jnp.transpose(weight_oihw, (2, 3, 1, 0)) * scale[None, None, None, :]
    w_packed = w_hwio.reshape(kh, kw * cin, cout)                    # matches x_packed lanes
    if cout_p != cout:
        w_packed = jnp.pad(w_packed, ((0, 0), (0, 0), (0, cout_p - cout)))
        bias = jnp.pad(bias, ((0, cout_p - cout),))
    w_packed = w_packed.astype(jnp.bfloat16)
    bias = bias.reshape(1, cout_p)

    kernel = functools.partial(_conv_bn_relu_kernel, kh=kh, sh=sh, dh=dh,
                               row_tile=row_tile, sub_rows=sub_rows, wo=wo)

    # TODO(synk): for very large images on v7x (64 MiB VMEM), replace the whole-image-
    # resident input with a row-band fetch (manual make_async_copy double-buffering).
    out = pl.pallas_call(
        kernel,
        out_shape=jax.ShapeDtypeStruct((n, ho_pad * wo, cout_p), jnp.bfloat16),
        grid_spec=pltpu.PrefetchScalarGridSpec(
            num_scalar_prefetch=0,
            grid=(n, grid_rows),
            in_specs=[
                # Whole packed image per batch index; index_map ignores `r`, so it is
                # DMA'd once per batch index and re-used across all row tiles.
                pl.BlockSpec((None, hin_p, wo, kw * cin), lambda b, r: (b, 0, 0, 0)),
                # Weight and bias resident across the whole grid.
                pl.BlockSpec((kh, kw * cin, cout_p), lambda b, r: (0, 0, 0)),
                pl.BlockSpec((1, cout_p), lambda b, r: (0, 0)),
            ],
            out_specs=pl.BlockSpec((None, row_tile * wo, cout_p),
                                   lambda b, r: (b, r, 0)),
        ),
        compiler_params=pltpu.CompilerParams(
            dimension_semantics=("parallel", "parallel"),
            vmem_limit_bytes=vmem_budget),
    )(x_packed, w_packed, bias)

    # (N, Ho_pad*Wo, Cout_p) -> NHWC -> NCHW.  The ragged-row / padded-channel slice
    # fuses into this one layout pass, kept only for PyTorch parity; when chaining
    # BasicConv2d layers keep NHWC/bf16 and drop this transpose.
    out = out.reshape(n, ho_pad, wo, cout_p)[:, :ho, :, :cout]
    return jnp.transpose(out, (0, 3, 1, 2))


if __name__ == "__main__":
    key = jax.random.PRNGKey(0)
    k_x, k_w, k_g, k_b, k_m, k_v = jax.random.split(key, 6)

    N, Cin, H, W = 2, 4, 16, 16
    Cout, KS, STRIDE, PAD, DIL = 8, 3, 1, 1, 1

    x = jax.random.normal(k_x, (N, Cin, H, W), dtype=jnp.float32)
    weight = jax.random.normal(k_w, (Cout, Cin, KS, KS), dtype=jnp.float32) * 0.1
    gamma = jax.random.uniform(k_g, (Cout,), minval=0.5, maxval=1.5, dtype=jnp.float32)
    beta = jax.random.normal(k_b, (Cout,), dtype=jnp.float32) * 0.1
    running_mean = jax.random.normal(k_m, (Cout,), dtype=jnp.float32) * 0.1
    running_var = jax.random.uniform(k_v, (Cout,), minval=0.5, maxval=1.5, dtype=jnp.float32)

    y = basic_conv2d(x, weight, gamma, beta, running_mean, running_var,
                     kernel_size=KS, stride=STRIDE, padding=PAD, dilation=DIL)
    y = jax.block_until_ready(y)
    assert y.shape == (N, Cout, H, W), y.shape

    # Numeric sanity check vs. a pure-JAX f32 reference (kernel runs bf16 in / bf16 out).
    conv = jax.lax.conv_general_dilated(
        x, weight, window_strides=(STRIDE, STRIDE),
        padding=[(PAD, PAD), (PAD, PAD)], rhs_dilation=(DIL, DIL),
        dimension_numbers=("NCHW", "OIHW", "NCHW"))
    scale = gamma / jnp.sqrt(running_var + 1e-5)
    ref = jnp.maximum(conv * scale[None, :, None, None]
                      + (beta - running_mean * scale)[None, :, None, None], 0.0)
    max_err = float(jnp.max(jnp.abs(y.astype(jnp.float32) - ref)))
    assert max_err < 0.2, f"max abs err {max_err}"

    print("KERNEL_OK")
</pallas_src>

<mosaic_0001>
module attributes {stable_mosaic.version = 11 : i64} {
  func.func @_conv_bn_relu_kernel(%arg0: i32, %arg1: i32, %arg2: memref<1x18x16x12xbf16, #tpu.memory_space<vmem>>, %arg3: memref<3x12x128xbf16, #tpu.memory_space<vmem>>, %arg4: memref<1x128xf32, #tpu.memory_space<vmem>>, %arg5: memref<1x128x128xbf16, #tpu.memory_space<vmem>>) attributes {dimension_semantics = [#tpu.dimension_semantics<parallel>, #tpu.dimension_semantics<parallel>], iteration_bounds = array<i64: 2, 2>, scalar_prefetch = 0 : i64, scratch_operands = 0 : i64, tpu.core_type = #tpu.core_type<tc>, window_params = [{transform_indices = @transform_0, window_bounds = array<i64: 1, 18, 16, 12>}, {pipeline_mode = #tpu.pipeline_mode<synchronous>, transform_indices = @transform_1, window_bounds = array<i64: 3, 12, 128>}, {pipeline_mode = #tpu.pipeline_mode<synchronous>, transform_indices = @transform_2, window_bounds = array<i64: 1, 128>}, {transform_indices = @transform_3, window_bounds = array<i64: 1, 128, 128>}]} {
    %c8_i32 = arith.constant 8 : i32
    %0 = arith.muli %arg1, %c8_i32 : i32
    %c0_i32 = arith.constant 0 : i32
    %1 = arith.addi %0, %c0_i32 : i32
    %c1_i32 = arith.constant 1 : i32
    %2 = arith.muli %1, %c1_i32 : i32
    %c0_i32_0 = arith.constant 0 : i32
    %3 = arith.addi %2, %c0_i32_0 : i32
    %c0 = arith.constant 0 : index
    %4 = arith.index_cast %3 : i32 to index
    %c0_1 = arith.constant 0 : index
    %c0_2 = arith.constant 0 : index
    %5 = vector.load %arg2[%c0, %4, %c0_1, %c0_2] : memref<1x18x16x12xbf16, #tpu.memory_space<vmem>>, vector<1x8x16x12xbf16>
    %6 = vector.shape_cast %5 : vector<1x8x16x12xbf16> to vector<8x16x12xbf16>
    %7 = vector.shape_cast %6 : vector<8x16x12xbf16> to vector<128x12xbf16>
    %c0_3 = arith.constant 0 : index
    %c0_4 = arith.constant 0 : index
    %c0_5 = arith.constant 0 : index
    %8 = vector.load %arg3[%c0_3, %c0_4, %c0_5] : memref<3x12x128xbf16, #tpu.memory_space<vmem>>, vector<1x12x128xbf16>
    %9 = vector.shape_cast %8 : vector<1x12x128xbf16> to vector<12x128xbf16>
    %cst = arith.constant dense<0.000000e+00> : vector<128x128xf32>
    %10 = tpu.matmul %7, %9, %cst {dimension_numbers = #tpu.dot_dimension_numbers<[1], [0], [0], [1], [0, 0, 1, 1], [], []>} : vector<128x12xbf16>, vector<12x128xbf16>, vector<128x128xf32> -> vector<128x128xf32>
    %c1_i32_6 = arith.constant 1 : i32
    %11 = arith.muli %1, %c1_i32_6 : i32
    %c1_i32_7 = arith.constant 1 : i32
    %12 = arith.addi %11, %c1_i32_7 : i32
    %c0_8 = arith.constant 0 : index
    %13 = arith.index_cast %12 : i32 to index
    %c0_9 = arith.constant 0 : index
    %c0_10 = arith.constant 0 : index
    %14 = vector.load %arg2[%c0_8, %13, %c0_9, %c0_10] : memref<1x18x16x12xbf16, #tpu.memory_space<vmem>>, vector<1x8x16x12xbf16>
    %15 = vector.shape_cast %14 : vector<1x8x16x12xbf16> to vector<8x16x12xbf16>
    %16 = vector.shape_cast %15 : vector<8x16x12xbf16> to vector<128x12xbf16>
    %c1 = arith.constant 1 : index
    %c0_11 = arith.constant 0 : index
    %c0_12 = arith.constant 0 : index
    %17 = vector.load %arg3[%c1, %c0_11, %c0_12] : memref<3x12x128xbf16, #tpu.memory_space<vmem>>, vector<1x12x128xbf16>
    %18 = vector.shape_cast %17 : vector<1x12x128xbf16> to vector<12x128xbf16>
    %cst_13 = arith.constant dense<0.000000e+00> : vector<128x128xf32>
    %19 = tpu.matmul %16, %18, %cst_13 {dimension_numbers = #tpu.dot_dimension_numbers<[1], [0], [0], [1], [0, 0, 1, 1], [], []>} : vector<128x12xbf16>, vector<12x128xbf16>, vector<128x128xf32> -> vector<128x128xf32>
    %20 = arith.addf %10, %19 : vector<128x128xf32>
    %c1_i32_14 = arith.constant 1 : i32
    %21 = arith.muli %1, %c1_i32_14 : i32
    %c2_i32 = arith.constant 2 : i32
    %22 = arith.addi %21, %c2_i32 : i32
    %c0_15 = arith.constant 0 : index
    %23 = arith.index_cast %22 : i32 to index
    %c0_16 = arith.constant 0 : index
    %c0_17 = arith.constant 0 : index
    %24 = vector.load %arg2[%c0_15, %23, %c0_16, %c0_17] : memref<1x18x16x12xbf16, #tpu.memory_space<vmem>>, vector<1x8x16x12xbf16>
    %25 = vector.shape_cast %24 : vector<1x8x16x12xbf16> to vector<8x16x12xbf16>
    %26 = vector.shape_cast %25 : vector<8x16x12xbf16> to vector<128x12xbf16>
    %c2 = arith.constant 2 : index
    %c0_18 = arith.constant 0 : index
    %c0_19 = arith.constant 0 : index
    %27 = vector.load %arg3[%c2, %c0_18, %c0_19] : memref<3x12x128xbf16, #tpu.memory_space<vmem>>, vector<1x12x128xbf16>
    %28 = vector.shape_cast %27 : vector<1x12x128xbf16> to vector<12x128xbf16>
    %cst_20 = arith.constant dense<0.000000e+00> : vector<128x128xf32>
    %29 = tpu.matmul %26, %28, %cst_20 {dimension_numbers = #tpu.dot_dimension_numbers<[1], [0], [0], [1], [0, 0, 1, 1], [], []>} : vector<128x12xbf16>, vector<12x128xbf16>, vector<128x128xf32> -> vector<128x128xf32>
    %30 = arith.addf %20, %29 : vector<128x128xf32>
    %c0_21 = arith.constant 0 : index
    %c0_22 = arith.constant 0 : index
    %31 = vector.load %arg4[%c0_21, %c0_22] : memref<1x128xf32, #tpu.memory_space<vmem>>, vector<1x128xf32>
    %32 = vector.broadcast %31 : vector<1x128xf32> to vector<128x128xf32>
    %33 = arith.addf %30, %32 : vector<128x128xf32>
    %cst_23 = arith.constant 0.000000e+00 : f32
    %34 = vector.broadcast %cst_23 : f32 to vector<128x128xf32>
    %35 = arith.maximumf %33, %34 : vector<128x128xf32>
    %36 = arith.truncf %35 : vector<128x128xf32> to vector<128x128xbf16>
    %c0_24 = arith.constant 0 : index
    %c0_25 = arith.constant 0 : index
    %c0_26 = arith.constant 0 : index
    %37 = vector.load %arg5[%c0_24, %c0_25, %c0_26] : memref<1x128x128xbf16, #tpu.memory_space<vmem>>, vector<1x128x128xbf16>
    %38 = vector.shape_cast %37 : vector<1x128x128xbf16> to vector<128x128xbf16>
    %39 = vector.shape_cast %36 : vector<128x128xbf16> to vector<1x128x128xbf16>
    tpu.vector_store %arg5[%c0_24, %c0_25, %c0_26], %39 {strides = array<i32>} : memref<1x128x128xbf16, #tpu.memory_space<vmem>>, vector<1x128x128xbf16>,
    return
  }
  func.func @transform_0(%arg0: i32, %arg1: i32) -> (i32, i32, i32, i32) {
    %c0_i32 = arith.constant 0 : i32
    %c0_i32_0 = arith.constant 0 : i32
    %c0_i32_1 = arith.constant 0 : i32
    %c0_i32_2 = arith.constant 0 : i32
    return %arg0, %c0_i32, %c0_i32_0, %c0_i32_1 : i32, i32, i32, i32
  }
  func.func @transform_1(%arg0: i32, %arg1: i32) -> (i32, i32, i32) {
    %c0_i32 = arith.constant 0 : i32
    %c0_i32_0 = arith.constant 0 : i32
    %c0_i32_1 = arith.constant 0 : i32
    %c0_i32_2 = arith.constant 0 : i32
    return %c0_i32, %c0_i32_0, %c0_i32_1 : i32, i32, i32
  }
  func.func @transform_2(%arg0: i32, %arg1: i32) -> (i32, i32) {
    %c0_i32 = arith.constant 0 : i32
    %c0_i32_0 = arith.constant 0 : i32
    %c0_i32_1 = arith.constant 0 : i32
    return %c0_i32, %c0_i32_0 : i32, i32
  }
  func.func @transform_3(%arg0: i32, %arg1: i32) -> (i32, i32, i32) {
    %c0_i32 = arith.constant 0 : i32
    %c0_i32_0 = arith.constant 0 : i32
    return %arg0, %arg1, %c0_i32 : i32, i32, i32
  }
}

</mosaic_0001>

<bundles_post_ra>
// kernel: basic_conv2d.1
= control target key start
LH: loop header
LB: loop body
LE: loop exit
PB: predicated region body
PF: predicated region fallthrough
CT: control target
= control target key end

     0   :  { %s1437_s12 = smov 0   ;;  %s1439_s13 = smov 0   ;;  %s1593_s0 = inlined_call_operand.vmem [shape: bf16[2,18,16,12], index: 0, kind: input, shape index: {}]   ;;  %s1594_s1 = inlined_call_operand.vmem [shape: bf16[3,12,128], index: 1, kind: input, shape index: {}]   ;;  %s1595_s2 = inlined_call_operand.vmem [shape: f32[1,128], index: 2, kind: input, shape index: {}]   ;;  %s1596_s3 = inlined_call_operand.vmem [shape: bf16[2,256,128], index: 3, kind: output, shape index: {}]  }
   0x1   :  { %s1441_s14 = smov 0   ;;  %s1443_s15 = smov 0  }
   0x2   :  { %s1445_s16 = smov 0  }
   0x3 LB: > { %s22_s17 = sadd.s32 1, %s1407_s14  ;;  %s25_s18 = sadd.s32 1, %s1411_s15  ;;  %s1415_s16 = sphi %s1445_s16, %s13_s16   ;;  %s1411_s15 = sphi %s1443_s15, %s1600_s15   ;;  %s1407_s14 = sphi %s1441_s14, %s1599_s14   ;;  %s1403_s13 = sphi %s1439_s13, %s1598_s13   ;;  %s1399_s12 = sphi %s1437_s12, %s1597_s12  }
   0x4   : > { %p23_p0 = scmp.ge.s32.totalorder %s22_s17, 2  ;;  %p1005_p1 = scmp.ge.s32.totalorder %s1415_s16, 1 }
   0x5   : > { %p151_p2 = scmp.lt.s32.totalorder %s1415_s16, 5 }
   0x6   : > { %s1602_s17 = smov (%p23_p0, %s22_s17), 0  ;;  %s1604_s18 = smov (!%p23_p0, %s25_s18), %s1411_s15 }
   0x7   : > { %p152_p3 = pnand %p1005_p1, %p151_p2  ;;  %p27_p4 = scmp.ge.s32.totalorder %s1604_s18, 2 }
   0x8   : > { %v1350_v0 = vld [vmem:[%s1594_s1 + $0x8] sm:$0x3f] (!%p152_p3)   ;;  %vm310_vm0 = vcmask (!%p152_p3), 1045504   ;;  %p179_p5 = scmp.lt.s32.totalorder (!%p152_p3), %s1403_s13, 1  ;;  %v1351_v1 = vld [vmem:[%s1594_s1] sm:$0x3f] (!%p152_p3)  }
   0x9   : > { %s1606_s18 = smov (%p27_p4, %s1604_s18), 0  ;;  %155 = sbr.rel (%p152_p3) target bundleno = 287 (0x11f), region = 32 }
   0xa   : > { %1305 = vmatprep.subr.msk.bf16.mxu1 (!%p152_p3), %vm310_vm0, %v1350_v0  ;;  %v312_v2 = vsel (!%p152_p3), %vm310_vm0, %v1350_v0, 0  ;;  %1306 = vmatprep.subr.msk.bf16.mxu0 (!%p152_p3), %vm310_vm0, %v1351_v1  ;;  %v481_v3 = vsel (!%p152_p3), %vm310_vm0, %v1351_v1, 0  ;;  %v1354_v4 = vld [vmem:[%s1594_s1 + $0x10] sm:$0x3f] (!%p152_p3)   ;;  %s1124_s26 = sshll.u32 (!%p152_p3), %s1399_s12, 6  ;;  %vm285_vm1 = vcmask (!%p152_p3), 97280  }
   0xb   : > { %1218 = vmatpush3.bf16.msra.mxu1 (!%p152_p3), %v312_v2  ;;  %1236 = vmatpush3.bf16.msra.mxu0 (!%p152_p3), %v481_v3  ;;  %v673_v9 = vsel (!%p152_p3), %vm310_vm0, %v1354_v4, 0  ;;  %s1007_s4 = sshll.u32 (!%p152_p3), %s1399_s12, 4  ;;  %v1547_v39 = vld [vmem:[%s1595_s2] ss:$0 sm:$0xff] (!%p152_p3) }
   0xc   : > { %1307 = vmatprep.subr.msk.bf16.mxu1 (!%p152_p3), %vm310_vm0, %v1351_v1  ;;  %1308 = vmatprep.subr.msk.bf16.mxu0 (!%p152_p3), %vm310_vm0, %v1354_v4  ;;  %p187_p6 = scmp.lt.s32.totalorder (!%p152_p3), %s1007_s4, 31 }
  0x10   : > { %s1608_s13 = smov (!%p179_p5, %s1403_s13), 1  ;;  %s1610_s4 = smov (!%p187_p6, %s1007_s4), 31 }
  0x11   : > { %s1309_s25 = smul.u32 144, %s1608_s13  ;;  %s1008_s5 = sshll.u32 %s1608_s13, 5 }
  0x12   : > { %s190_s8 = sadd.s32 %s1008_s5, %s1610_s4 }
  0x13   : > { %s183_s29 = scalar_lea.vmem %s1593_s0, %s1309_s25  ;;  %s1009_s9 = sshll.u32 %s190_s8, 2 }
  0x14   : > { %s1491_s30 = scalar_lea.vmem %s183_s29, %s1124_s26  ;;  %s1556_s12 = scalar_lea.vmem %s1596_s3, %s1009_s9 }
  0x15   : > { %v1352_v5 = vld [vmem:[%s1491_s30 + $0x8] sm:$0xff]   ;;  %v1353_v6 = vld [vmem:[%s1491_s30] sm:$0xff]   ;;  %v1355_v7 = vld [vmem:[%s1491_s30 + $0x10] sm:$0xff]  }
  0x16   : > { %1219 = vmatprep.mubr.msk.bf16.mxu1 %vm285_vm1, %v1352_v5  ;;  %1237 = vmatprep.mubr.msk.bf16.mxu0 %vm285_vm1, %v1353_v6  ;;  %v1356_v8 = vld [vmem:[%s1491_s30 + $0x8] sm:$0xff]   ;;  %v1357_v10 = vld [vmem:[%s1491_s30 + $0x18] sm:$0xff]   ;;  %v1358_v11 = vld [vmem:[%s1491_s30 + $0x10] sm:$0xff]  }
  0x17   : > { %1220 = vmatmul.mubr.msk.bf16.vlgmr.msra.gmra.mrb[0].mxu1 %vm285_vm1, %v1355_v7  ;;  %1238 = vmatmul.mubr.msk.bf16.vlgmr.msra.gmra.mrb[0].mxu0 %vm285_vm1, %v1356_v8  ;;  %v1359_v12 = vld [vmem:[%s1491_s30 + $0x20] sm:$0xff]   ;;  %v1360_v13 = vld [vmem:[%s1491_s30 + $0x18] sm:$0xff]   ;;  %v1361_v14 = vld [vmem:[%s1491_s30 + $0x28] sm:$0xff]  }
  0x18   : > { %1272 = vmatpush3.bf16.msra.mxu1 %v481_v3  ;;  %1254 = vmatpush3.bf16.msra.mxu0 %v673_v9  ;;  %v1362_v15 = vld [vmem:[%s1491_s30 + $0x10] sm:$0xff]   ;;  %v1364_v17 = vld [vmem:[%s1491_s30 + $0x18] sm:$0xff]   ;;  %v1366_v19 = vld [vmem:[%s1491_s30 + $0x20] sm:$0xff]  }
  0x19   : > { %1223 = vmatprep.mubr.msk.bf16.mxu1 %vm285_vm1, %v1357_v10  ;;  %1241 = vmatprep.mubr.msk.bf16.mxu0 %vm285_vm1, %v1358_v11  ;;  %v1363_v16 = vld [vmem:[%s1491_s30 + $0x30] sm:$0xff]   ;;  %v1365_v18 = vld [vmem:[%s1491_s30 + $0x38] sm:$0xff]   ;;  %v1367_v20 = vld [vmem:[%s1491_s30 + $0x40] sm:$0xff]  }
  0x1a   : > { %v1368_v21 = vld [vmem:[%s1491_s30 + $0x28] sm:$0xff]   ;;  %v1369_v22 = vld [vmem:[%s1491_s30 + $0x20] sm:$0xff]   ;;  %v1370_v23 = vld [vmem:[%s1491_s30 + $0x30] sm:$0xff]  }
  0x1b   : > { %v1371_v24 = vld [vmem:[%s1491_s30 + $0x28] sm:$0xff]   ;;  %v1372_v25 = vld [vmem:[%s1491_s30 + $0x38] sm:$0xff]   ;;  %v1373_v26 = vld [vmem:[%s1491_s30 + $0x30] sm:$0xff]  }
  0x1c   : > { %v1374_v27 = vld [vmem:[%s1491_s30 + $0x40] sm:$0xff]   ;;  %v1375_v28 = vld [vmem:[%s1491_s30 + $0x38] sm:$0xff]   ;;  %v1376_v29 = vld [vmem:[%s1491_s30 + $0x48] sm:$0xff]  }
  0x1f   : > { %1224 = vmatmul.mubr.msk.bf16.gmra.mrb[4].mxu1 %vm285_vm1, %v1359_v12  ;;  %1242 = vmatmul.mubr.msk.bf16.gmra.mrb[4].mxu0 %vm285_vm1, %v1360_v13 }
  0x20   : > { %1227 = vmatprep.mubr.msk.bf16.mxu1 %vm285_vm1, %v1361_v14  ;;  %1255 = vmatprep.mubr.msk.bf16.mxu0 %vm285_vm1, %v1362_v15 }
  0x27   : > { %1228 = vmatmul.mubr.msk.bf16.gmra.mrb[8].mxu1 %vm285_vm1, %v1363_v16  ;;  %1256 = vmatmul.mubr.msk.bf16.vlgmr.msra.gmra.mrb[0].mxu0 %vm285_vm1, %v1364_v17 }
  0x28   : > { %1231 = vmatprep.mubr.msk.bf16.mxu1 %vm285_vm1, %v1365_v18  ;;  %1259 = vmatprep.mubr.msk.bf16.mxu0 %vm285_vm1, %v1366_v19 }
  0x2f   : > { %1232 = vmatmul.mubr.msk.bf16.gmra.mrb[12].mxu1 %vm285_vm1, %v1367_v20  ;;  %1260 = vmatmul.mubr.msk.bf16.gmra.mrb[4].mxu0 %vm285_vm1, %v1368_v21 }
  0x30   : > { %1245 = vmatprep.mubr.msk.bf16.mxu1 %vm285_vm1, %v1369_v22  ;;  %1263 = vmatprep.mubr.msk.bf16.mxu0 %vm285_vm1, %v1370_v23 }
  0x37   : > { %1246 = vmatmul.mubr.msk.bf16.vlgmr.msra.gmra.mrb[8].mxu1 %vm285_vm1, %v1371_v24  ;;  %1264 = vmatmul.mubr.msk.bf16.gmra.mrb[8].mxu0 %vm285_vm1, %v1372_v25 }
  0x38   : > { %1249 = vmatprep.mubr.msk.bf16.mxu1 %vm285_vm1, %v1373_v26  ;;  %1267 = vmatprep.mubr.msk.bf16.mxu0 %vm285_vm1, %v1374_v27 }
  0x3f   : > { %1250 = vmatmul.mubr.msk.bf16.gmra.mrb[12].mxu1 %vm285_vm1, %v1375_v28  ;;  %1268 = vmatmul.mubr.msk.bf16.gmra.mrb[12].mxu0 %vm285_vm1, %v1376_v29 }
  0xea   : > { %v1221_v30 = vpop.f32.mrb[0].mxu1 }
  0xeb   : > { %v348_v31 = vpop.f32.mrb[1].mxu1 }
  0xec   : > { %v1222_v32 = vpop.f32.mrb[2].mxu1 }
  0xed   : > { %v351_v33 = vpop.f32.mrb[3].mxu1 }
  0xf2   : > { %v1225_v34 = vpop.f32.mrb[4].mxu1 }
  0xf3   : > { %v364_v35 = vpop.f32.mrb[5].mxu1 }
  0xf4   : > { %v1226_v36 = vpop.f32.mrb[6].mxu1 }
  0xf5   : > { %v367_v37 = vpop.f32.mrb[7].mxu1 }
  0xfa   : > { %v1257_v38 = vpop.f32.mrb[0].mxu0 }
  0xfb   : > { %v1273_v40 = vadd.f32 %v1257_v38, %v1221_v30  ;;  %v709_v41 = vpop.f32.mrb[1].mxu0 }
  0xfc   : > { %v1274_v42 = vadd.f32 %v709_v41, %v348_v31  ;;  %v1258_v43 = vpop.f32.mrb[2].mxu0 }
  0xfd   : > { %v797_v44 = vadd.f32 %v1273_v40, %v1547_v39  ;;  %v1275_v45 = vadd.f32 %v1258_v43, %v1222_v32  ;;  %v712_v46 = vpop.f32.mrb[3].mxu0 }
  0xfe   : > { %v795_v47 = vadd.f32 %v1274_v42, %v1547_v39  ;;  %v1276_v48 = vadd.f32 %v712_v46, %v351_v33 }
  0xff   : > { %v798_v49 = vadd.f32 %v1275_v45, %v1547_v39  ;;  %v813_v51 = vmax.f32 %v797_v44, 0.0 }
 0x100   : > { %v796_v50 = vadd.f32 %v1276_v48, %v1547_v39  ;;  %v811_v53 = vmax.f32 %v795_v47, 0.0 }
 0x101   : > { %v814_v52 = vmax.f32 %v798_v49, 0.0 }
 0x102   : > { %v812_v54 = vmax.f32 %v796_v50, 0.0  ;;  %v1261_v55 = vpop.f32.mrb[4].mxu0 }
 0x103   : > { %v1151_v56 = vpack.c.bf16 %v814_v52, %v813_v51  ;;  %v1277_v57 = vadd.f32 %v1261_v55, %v1225_v34  ;;  %v725_v58 = vpop.f32.mrb[5].mxu0 }
 0x104   : > { %v1146_v59 = vpack.c.bf16 %v812_v54, %v811_v53  ;;  %v1278_v60 = vadd.f32 %v725_v58, %v364_v35  ;;  %v1262_v61 = vpop.f32.mrb[6].mxu0 }
 0x105   : > { %1183 = vst [vmem:[%s1556_s12 + $0x8] sm:$0xff] %v1151_v56   ;;  %v801_v62 = vadd.f32 %v1277_v57, %v1547_v39  ;;  %v1279_v63 = vadd.f32 %v1262_v61, %v1226_v36  ;;  %v728_v0 = vpop.f32.mrb[7].mxu0 }
 0x106   : > { %1147 = vst [vmem:[%s1556_s12] sm:$0xff] %v1146_v59   ;;  %v799_v1 = vadd.f32 %v1278_v60, %v1547_v39  ;;  %v1280_v2 = vadd.f32 %v728_v0, %v367_v37 }
 0x107   : > { %v802_v3 = vadd.f32 %v1279_v63, %v1547_v39  ;;  %v817_v5 = vmax.f32 %v801_v62, 0.0 }
 0x108   : > { %v800_v4 = vadd.f32 %v1280_v2, %v1547_v39  ;;  %v815_v8 = vmax.f32 %v799_v1, 0.0 }
 0x109   : > { %v818_v6 = vmax.f32 %v802_v3, 0.0 }
 0x10a   : > { %v1247_v7 = vpop.f32.mrb[8].mxu1  ;;  %v816_v9 = vmax.f32 %v800_v4, 0.0  ;;  %v1265_v10 = vpop.f32.mrb[8].mxu0 }
 0x10b   : > { %v549_v11 = vpop.f32.mrb[9].mxu1  ;;  %v1161_v12 = vpack.c.bf16 %v818_v6, %v817_v5  ;;  %v1281_v13 = vadd.f32 %v1265_v10, %v1247_v7  ;;  %v741_v14 = vpop.f32.mrb[9].mxu0 }
 0x10c   : > { %v1248_v15 = vpop.f32.mrb[10].mxu1  ;;  %v1156_v16 = vpack.c.bf16 %v816_v9, %v815_v8  ;;  %v1282_v17 = vadd.f32 %v741_v14, %v549_v11  ;;  %v1266_v18 = vpop.f32.mrb[10].mxu0 }
 0x10d   : > { %v552_v19 = vpop.f32.mrb[11].mxu1  ;;  %1185 = vst [vmem:[%s1556_s12 + $0x18] sm:$0xff] %v1161_v12   ;;  %v805_v20 = vadd.f32 %v1281_v13, %v1547_v39  ;;  %v1283_v21 = vadd.f32 %v1266_v18, %v1248_v15  ;;  %v744_v22 = vpop.f32.mrb[11].mxu0 }
 0x10e   : > { %1184 = vst [vmem:[%s1556_s12 + $0x10] sm:$0xff] %v1156_v16   ;;  %v803_v23 = vadd.f32 %v1282_v17, %v1547_v39  ;;  %v1284_v24 = vadd.f32 %v744_v22, %v552_v19 }
 0x10f   : > { %v806_v25 = vadd.f32 %v1283_v21, %v1547_v39  ;;  %v821_v27 = vmax.f32 %v805_v20, 0.0 }
 0x110   : > { %v804_v26 = vadd.f32 %v1284_v24, %v1547_v39  ;;  %v819_v30 = vmax.f32 %v803_v23, 0.0 }
 0x111   : > { %v822_v28 = vmax.f32 %v806_v25, 0.0 }
 0x112   : > { %v1251_v29 = vpop.f32.mrb[12].mxu1  ;;  %v820_v31 = vmax.f32 %v804_v26, 0.0  ;;  %v1269_v32 = vpop.f32.mrb[12].mxu0 }
 0x113   : > { %v565_v33 = vpop.f32.mrb[13].mxu1  ;;  %v1171_v34 = vpack.c.bf16 %v822_v28, %v821_v27  ;;  %v1285_v35 = vadd.f32 %v1269_v32, %v1251_v29  ;;  %v757_v36 = vpop.f32.mrb[13].mxu0 }
 0x114   : > { %v1252_v37 = vpop.f32.mrb[14].mxu1  ;;  %v1166_v38 = vpack.c.bf16 %v820_v31, %v819_v30  ;;  %v1286_v40 = vadd.f32 %v757_v36, %v565_v33  ;;  %v1270_v41 = vpop.f32.mrb[14].mxu0 }
 0x115   : > { %v568_v42 = vpop.f32.mrb[15].mxu1  ;;  %1187 = vst [vmem:[%s1556_s12 + $0x28] sm:$0xff] %v1171_v34   ;;  %v809_v43 = vadd.f32 %v1285_v35, %v1547_v39  ;;  %v1287_v44 = vadd.f32 %v1270_v41, %v1252_v37  ;;  %v760_v45 = vpop.f32.mrb[15].mxu0 }
 0x116   : > { %1186 = vst [vmem:[%s1556_s12 + $0x20] sm:$0xff] %v1166_v38   ;;  %v807_v46 = vadd.f32 %v1286_v40, %v1547_v39  ;;  %v1288_v47 = vadd.f32 %v760_v45, %v568_v42 }
 0x117   : > { %v810_v48 = vadd.f32 %v1287_v44, %v1547_v39  ;;  %v825_v50 = vmax.f32 %v809_v43, 0.0 }
 0x118   : > { %v808_v49 = vadd.f32 %v1288_v47, %v1547_v39  ;;  %v823_v52 = vmax.f32 %v807_v46, 0.0 }
 0x119   : > { %v826_v51 = vmax.f32 %v810_v48, 0.0 }
 0x11a   : > { %v824_v53 = vmax.f32 %v808_v49, 0.0 }
 0x11b   : > { %v1181_v54 = vpack.c.bf16 %v826_v51, %v825_v50 }
 0x11c   : > { %v1176_v55 = vpack.c.bf16 %v824_v53, %v823_v52 }
 0x11d   : > { %1189 = vst [vmem:[%s1556_s12 + $0x38] sm:$0xff] %v1181_v54  }
 0x11e   : > { %1188 = vst [vmem:[%s1556_s12 + $0x30] sm:$0xff] %v1176_v55  }
 0x11f PF: > { %s13_s16 = sadd.s32 1, %s1415_s16   ;;  %s1597_s12 = smov %s1407_s14 }
 0x120   : > { %p10_p7 = scmp.ge.s32.totalorder %s13_s16, 6   ;;  %s1598_s13 = smov %s1411_s15 }
 0x121   : > { %s1599_s14 = smov %s1602_s17  ;;  %s1600_s15 = smov %s1606_s18 }
 0x122   :  { %12 = sbr.rel (!%p10_p7) target bundleno = 3 (0x3), region = 67 }

</bundles_post_ra>
